<compile_context>
chip_gen: v7x
topology: tpu7x:2x2x1
jax: 0.10.0
libtpu: 0.0.40
codegen_flags: <defaults>
</compile_context>

<pallas_src>
import jax
import jax.numpy as jnp
from jax.experimental import pallas as pl
from jax.experimental.pallas import tpu as pltpu


def linear_leaky_kernel(ns_ref, x_ref, p_ref, o_ref):
    """x_ref: (B, IN), p_ref: (IN+1, OUT) packed [W^T ; bias], o_ref: (B, OUT)."""
    in_dim = x_ref.shape[-1]
    w = p_ref[:in_dim, :]            # (IN, OUT) weights
    b = p_ref[in_dim:in_dim + 1, :]  # (1, OUT) bias
    # MXU matmul with f32 accumulation: (B, IN) @ (IN, OUT) -> (B, OUT)
    y = jnp.dot(x_ref[...], w, preferred_element_type=jnp.float32) + b
    ns = ns_ref[0]                   # learnable negative_slope scalar from SMEM
    # Parametric leaky ReLU (jnp.where, not maximum: slope may be > 1).
    o_ref[...] = jnp.where(y >= 0, y, ns * y).astype(o_ref.dtype)


def _pack_params(w_t, b):
    """Pack W^T (IN, OUT) and bias (OUT,) into one (IN+1, OUT) f32 buffer."""
    out_dim = w_t.shape[1]
    return jnp.concatenate(
        [w_t.astype(jnp.float32), b.reshape(1, out_dim).astype(jnp.float32)], axis=0
    )


def model_forward(x, w_t, b, negative_slope):
    """Single-tile forward: x (B, IN) -> (B, OUT). Gridless, whole arrays in VMEM."""
    B, IN = x.shape
    OUT = w_t.shape[1]
    params = _pack_params(w_t, b)                               # (IN+1, OUT)
    ns = jnp.asarray(negative_slope, jnp.float32).reshape(1)    # runtime SMEM input

    flops = 2 * B * IN * OUT
    bytes_accessed = 4 * (B * IN + (IN + 1) * OUT + B * OUT)

    return pl.pallas_call(
        linear_leaky_kernel,
        out_shape=jax.ShapeDtypeStruct((B, OUT), jnp.float32),
        in_specs=[
            pl.BlockSpec(memory_space=pltpu.MemorySpace.SMEM),   # negative_slope
            pl.BlockSpec(memory_space=pltpu.MemorySpace.VMEM),   # x
            pl.BlockSpec(memory_space=pltpu.MemorySpace.VMEM),   # packed [W^T ; b]
        ],
        out_specs=pl.BlockSpec(memory_space=pltpu.MemorySpace.VMEM),
        cost_estimate=pl.CostEstimate(
            flops=flops, transcendentals=0, bytes_accessed=bytes_accessed),
    )(ns, x, params)


def model_forward_batched(xs, w_t, b, negative_slope):
    """Batched forward: xs (N, B, IN) -> (N, B, OUT).

    1-D grid over N; packed params have a constant index_map so they are loaded
    once and stay VMEM-resident while x/out tiles stream.
    """
    N, B, IN = xs.shape
    OUT = w_t.shape[1]
    params = _pack_params(w_t, b)                               # (IN+1, OUT)
    ns = jnp.asarray(negative_slope, jnp.float32).reshape(1)

    flops = 2 * N * B * IN * OUT
    bytes_accessed = 4 * (N * B * IN + (IN + 1) * OUT + N * B * OUT)

    grid_spec = pltpu.PrefetchScalarGridSpec(
        num_scalar_prefetch=1,                                   # ns -> SMEM
        grid=(N,),
        in_specs=[
            # x tile: one (B, IN) slab per grid step (leading dim squeezed).
            pl.BlockSpec((None, B, IN), lambda i, ns_ref: (i, 0, 0)),
            # packed params: constant index_map -> resident across all steps.
            pl.BlockSpec((IN + 1, OUT), lambda i, ns_ref: (0, 0)),
        ],
        out_specs=pl.BlockSpec((None, B, OUT), lambda i, ns_ref: (i, 0, 0)),
    )

    return pl.pallas_call(
        linear_leaky_kernel,
        out_shape=jax.ShapeDtypeStruct((N, B, OUT), jnp.float32),
        grid_spec=grid_spec,
        compiler_params=pltpu.CompilerParams(
            dimension_semantics=("parallel",)),                  # v7x: 2 TCs share N
        cost_estimate=pl.CostEstimate(
            flops=flops, transcendentals=0, bytes_accessed=bytes_accessed),
    )(ns, xs, params)


def _reference(x, w, b, ns):
    y = x @ w.T + b
    return jnp.where(y >= 0, y, ns * y)


if __name__ == "__main__":
    key = jax.random.PRNGKey(0)
    kx, kw, kb, kn = jax.random.split(key, 4)

    B, IN, OUT = 8, 64, 128
    x1 = jax.random.normal(kx, (B, IN), dtype=jnp.float32)

    # Deterministic parameter init (mimics nn.Linear uniform(-1/sqrt(IN), 1/sqrt(IN)))
    bound = 1.0 / jnp.sqrt(jnp.float32(IN))
    w = jax.random.uniform(kw, (OUT, IN), minval=-bound, maxval=bound, dtype=jnp.float32)
    b = jax.random.uniform(kb, (OUT,), minval=-bound, maxval=bound, dtype=jnp.float32)
    # Learnable scalar passed as a jnp array (never baked in at trace time).
    negative_slope = jnp.float32(0.01)

    # --- single-tile forward (matches the PyTorch Model exactly) ---
    out = model_forward(x1, w.T, b, negative_slope)
    out = jax.block_until_ready(out)
    ref = _reference(x1, w, b, negative_slope)
    assert out.shape == (B, OUT)
    assert jnp.allclose(out, ref, atol=1e-5, rtol=1e-5)

    # --- batched forward (weights resident, grid over stacked inputs) ---
    N = 4
    xs = jax.random.normal(kn, (N, B, IN), dtype=jnp.float32)
    outs = model_forward_batched(xs, w.T, b, negative_slope)
    outs = jax.block_until_ready(outs)
    refs = jax.vmap(lambda xb: _reference(xb, w, b, negative_slope))(xs)
    assert outs.shape == (N, B, OUT)
    assert jnp.allclose(outs, refs, atol=1e-5, rtol=1e-5)

    print("KERNEL_OK")
</pallas_src>

<mosaic_0001>
module attributes {stable_mosaic.version = 11 : i64} {
  func.func @linear_leaky_kernel(%arg0: memref<1xf32, #tpu.memory_space<smem>>, %arg1: memref<8x64xf32, #tpu.memory_space<vmem>>, %arg2: memref<65x128xf32, #tpu.memory_space<vmem>>, %arg3: memref<8x128xf32, #tpu.memory_space<vmem>>) attributes {dimension_semantics = [], scalar_prefetch = 0 : i64, scratch_operands = 0 : i64, tpu.core_type = #tpu.core_type<tc>} {
    %c0 = arith.constant 0 : index
    %c0_0 = arith.constant 0 : index
    %0 = vector.load %arg2[%c0, %c0_0] : memref<65x128xf32, #tpu.memory_space<vmem>>, vector<64x128xf32>
    %c64 = arith.constant 64 : index
    %c0_1 = arith.constant 0 : index
    %1 = vector.load %arg2[%c64, %c0_1] : memref<65x128xf32, #tpu.memory_space<vmem>>, vector<1x128xf32>
    %c0_2 = arith.constant 0 : index
    %c0_3 = arith.constant 0 : index
    %2 = vector.load %arg1[%c0_2, %c0_3] : memref<8x64xf32, #tpu.memory_space<vmem>>, vector<8x64xf32>
    %cst = arith.constant dense<0.000000e+00> : vector<8x128xf32>
    %3 = tpu.matmul %2, %0, %cst {dimension_numbers = #tpu.dot_dimension_numbers<[1], [0], [0], [1], [0, 0, 1, 1], [], []>} : vector<8x64xf32>, vector<64x128xf32>, vector<8x128xf32> -> vector<8x128xf32>
    %4 = vector.broadcast %1 : vector<1x128xf32> to vector<8x128xf32>
    %5 = arith.addf %3, %4 : vector<8x128xf32>
    %c0_4 = arith.constant 0 : index
    %6 = memref.load %arg0[%c0_4] : memref<1xf32, #tpu.memory_space<smem>>
    %cst_5 = arith.constant 0.000000e+00 : f32
    %7 = vector.broadcast %cst_5 : f32 to vector<8x128xf32>
    %8 = arith.cmpf oge, %5, %7 : vector<8x128xf32>
    %9 = vector.broadcast %6 : f32 to vector<8x128xf32>
    %10 = arith.mulf %9, %5 : vector<8x128xf32>
    %11 = arith.select %8, %5, %10 : vector<8x128xi1>, vector<8x128xf32>
    %c0_6 = arith.constant 0 : index
    %c0_7 = arith.constant 0 : index
    %12 = vector.load %arg3[%c0_6, %c0_7] : memref<8x128xf32, #tpu.memory_space<vmem>>, vector<8x128xf32>
    tpu.vector_store %arg3[%c0_6, %c0_7], %11 {strides = array<i32>} : memref<8x128xf32, #tpu.memory_space<vmem>>, vector<8x128xf32>,
    return
  }
}

</mosaic_0001>

<bundles_post_ra>
// kernel: tpu_custom_call.1
= control target key start
LH: loop header
LB: loop body
LE: loop exit
PB: predicated region body
PF: predicated region fallthrough
CT: control target
= control target key end

     0   :  { %9 = vsyncpa [#allocation4], 0  ;;  %s348_s0 = inlined_call_operand.<no memory space> [shape: f32[1], index: 0, kind: input, shape index: {}]   ;;  %s349_s1 = inlined_call_operand.hbm [shape: f32[8,64], index: 1, kind: input, shape index: {}]   ;;  %s350_s2 = inlined_call_operand.hbm [shape: f32[65,128], index: 2, kind: input, shape index: {}]   ;;  %s351_s3 = inlined_call_operand.hbm [shape: f32[8,128], index: 3, kind: output, shape index: {}]  }
   0x1   :  { %10 = vsyncpa [#allocation7], 0 }
   0x2   :  { %11 = vsyncpa [#allocation5], 0  ;;  %s274_s12 = smov [#allocation3]   ;;  %s275_s14 = smov [#allocation6]  }
   0x3   :  { %s20_s13 = sshll.u32 %s274_s12, 4  ;;  %s29_s15 = sshll.u32 %s275_s14, 4  ;;  %s21_s13 = int_to_ptr.vmem [resolvable:$true] %s20_s13  ;;  %s302_s15 = int_to_ptr.vmem [resolvable:$true] %s29_s15 }
   0x4   :  { %s202_s18 = scalar_lea.hbm %s349_s1, 128 }
   0x5   :  { %p203_p0 = scmp.ne.s32.totalorder %s349_s1, %s202_s18  ;;  %p206_p1 = scmp.lt.u32.totalorder %s202_s18, %s349_s1 }
   0x7   :  { %p208_p2 = pnand %p206_p1, %p203_p0 }
   0x9   :  { %211 = shalt.err (!%p208_p2)
}
   0xa   :  { %s212_s23 = scalar_lea.vmem %s21_s13, 128  ;;  %p217_p4 = scmp.lt.s32.totalorder %s21_s13, %s21_s13 }
   0xb   :  { %p213_p3 = scmp.ne.s32.totalorder %s21_s13, %s212_s23  ;;  %p218_p5 = scmp.lt.s32.totalorder %s212_s23, %s212_s23 }
   0xd   :  { %p219_p6 = por %p218_p5, %p217_p4 }
   0xf   :  { %p220_p7 = pnand %p219_p6, %p213_p3 }
  0x11   :  { %223 = shalt.err (!%p220_p7)
}
  0x12   :  { %23 = dma.hbm_to_vmem [thread:$0]  %s349_s1, 128, %s21_s13, [#allocation4]  }
  0x13   :  { %s224_s28 = scalar_lea.hbm %s350_s2, 1152 }
  0x14   :  { %p225_p8 = scmp.ne.s32.totalorder %s350_s2, %s224_s28  ;;  %p228_p9 = scmp.lt.u32.totalorder %s224_s28, %s350_s2 }
  0x16   :  { %p230_p10 = pnand %p228_p9, %p225_p8 }
  0x18   :  { %233 = shalt.err (!%p230_p10)
}
  0x19   :  { %s234_s6 = scalar_lea.vmem %s302_s15, 1152  ;;  %p239_p12 = scmp.lt.s32.totalorder %s302_s15, %s302_s15 }
  0x1a   :  { %p235_p11 = scmp.ne.s32.totalorder %s302_s15, %s234_s6  ;;  %p240_p13 = scmp.lt.s32.totalorder %s234_s6, %s234_s6 }
  0x1c   :  { %p241_p0 = por %p240_p13, %p239_p12 }
  0x1e   :  { %p242_p1 = pnand %p241_p0, %p235_p11 }
  0x20   :  { %245 = shalt.err (!%p242_p1)
}
  0x21   :  { %s276_s1 = smov 128   ;;  %s277_s7 = smov 8  }
  0x22   :  { %35 = dma.hbm_to_vmem [thread:$0]  %s350_s2, 1152, %s302_s15, [#allocation7], %s276_s1, %s276_s1, %s277_s7  }
  0x23   :  { %268 = dma.done.wait [#allocation4], 128  }
  0x24   :  { %269 = vsyncadd [#allocation4], 4294967168 }
  0x25   :  { %270 = dma.done.wait [#allocation7], 1152  }
  0x26   :  { %271 = vsyncadd [#allocation7], 4294966144  ;;  %v278_v0 = vmov 0.0|0.0   ;;  %vm279_vm0 = vmmov 0   ;;  %v280_v1 = vmov 0.0   ;;  %v42_v2 = vld [vmem:[#allocation6] sm:$0xff]  ;;  %v132_v17 = vstv %s348_s0 }
  0x27   :  { %182 = vmatprep.subr.bf16.mxu0 %v278_v0  ;;  %179 = vmatprep.mubr.msk.f32.mxu0 %vm279_vm0, %v280_v1  ;;  %v43_v3 = vld [vmem:[#allocation6 + $0x8] sm:$0xff]  ;;  %v44_v4 = vld [vmem:[#allocation6 + $0x10] sm:$0xff]  ;;  %v45_v6 = vld [vmem:[#allocation6 + $0x18] sm:$0xff]  ;;  %vm56_vm1 = vcmask 523264   ;;  %s281_s11 = smov [#allocation8]  }
  0x28   :  { %v183_v5 = vpack.c.bf16 %v43_v3, %v42_v2  ;;  %v186_v7 = vpack.c.bf16 %v45_v6, %v44_v4  ;;  %v46_v8 = vld [vmem:[#allocation6 + $0x20] sm:$0xff]  ;;  %v47_v9 = vld [vmem:[#allocation6 + $0x28] sm:$0xff]  ;;  %v48_v11 = vld [vmem:[#allocation6 + $0x30] sm:$0xff]  ;;  %s142_s12 = sshll.u32 %s281_s11, 4  ;;  %s143_s12 = int_to_ptr.vmem [resolvable:$true] %s142_s12 }
  0x29   :  { %v189_v10 = vpack.c.bf16 %v47_v9, %v46_v8  ;;  %v49_v12 = vld [vmem:[#allocation6 + $0x38] sm:$0xff]  ;;  %v152_v15 = vld [vmem:[#allocation6 + $0x40] ss:$0 sm:$0xff]  ;;  %s246_s13 = scalar_lea.vmem %s143_s12, 128  ;;  %p251_p3 = scmp.lt.s32.totalorder %s143_s12, %s143_s12 }
  0x2a   :  { %184 = vmatpush3.bf16.msra.mxu0 %v183_v5  ;;  %v192_v13 = vpack.c.bf16 %v49_v12, %v48_v11  ;;  %v51_v14 = vld [vmem:[#allocation3] sm:$0xff]  ;;  %p247_p2 = scmp.ne.s32.totalorder %s143_s12, %s246_s13  ;;  %p252_p4 = scmp.lt.s32.totalorder %s246_s13, %s246_s13 }
  0x2b   :  { %185 = vmatprep.subr.bf16.mxu0 %v278_v0 }
  0x2c   :  { %p253_p5 = por %p252_p4, %p251_p3 }
  0x2e   :  { %187 = vmatpush3.bf16.msra.mxu0 %v186_v7  ;;  %p254_p6 = pnand %p253_p5, %p247_p2 }
  0x2f   :  { %188 = vmatprep.subr.bf16.mxu0 %v278_v0 }
  0x32   :  { %190 = vmatpush3.bf16.msra.mxu0 %v189_v10 }
  0x33   :  { %191 = vmatprep.subr.bf16.mxu0 %v278_v0 }
  0x36   :  { %193 = vmatpush3.bf16.msra.mxu0 %v192_v13 }
  0x39   :  { %180 = vmatmul.mubr.msk.f32.vlgmr.msra.gmra.mrb[0].mxu0 %vm56_vm1, %v51_v14 }
 0x10c   :  { %v126_v16 = vpop.f32.mrb[0].mxu0 }
 0x10d   :  { %v127_v18 = vadd.f32 %v152_v15, %v126_v16  ;;  %v181_v19 = vpop.f32.mrb[1].mxu0 }
 0x10f   :  { %v133_v20 = vmul.f32 %v132_v17, %v127_v18  ;;  %vm131_vm2 = vcmp.ge.f32.partialorder %v127_v18, 0.0 }
 0x111   :  { %v134_v21 = vsel %vm131_vm2, %v127_v18, %v133_v20 }
 0x112   :  { %135 = vst [vmem:[#allocation8] sm:$0xff] %v134_v21 }
 0x113   :  { %257 = shalt.err (!%p254_p6)
}
 0x114   :  { %s258_s0 = scalar_lea.hbm %s351_s3, 128 }
 0x115   :  { %p259_p7 = scmp.ne.s32.totalorder %s351_s3, %s258_s0  ;;  %p262_p8 = scmp.lt.u32.totalorder %s258_s0, %s351_s3 }
 0x117   :  { %p264_p9 = pnand %p262_p8, %p259_p7 }
 0x119   :  { %267 = shalt.err (!%p264_p9)
}
 0x11a   :  { %145 = dma.vmem_to_hbm [thread:$0]  %s143_s12, 128, %s351_s3, [#allocation5]  }
 0x11b   :  { %272 = dma.done.wait [#allocation5], 128  }
 0x11c   :  { %273 = vsyncadd [#allocation5], 4294967168 }
 0x11d   :  { %149 = vsyncpa [#allocation4], 1 }
 0x11e   :  { %150 = vsyncpa [#allocation7], 1 }
 0x11f   :  { %151 = vsyncpa [#allocation5], 1 }

</bundles_post_ra>
